<compile_context>
chip_gen: v6e
topology: v6e:2x2x1
jax: 0.10.0
libtpu: 0.0.40
codegen_flags: <defaults>
</compile_context>

<pallas_src>
import functools

import jax
import jax.numpy as jnp
from jax.experimental import pallas as pl
from jax.experimental.pallas import tpu as pltpu

LANE = 128      # vreg lane width
SUBLANE = 8     # f32 sublane tile


def _round_up(v, m):
    return -(-v // m) * m


def _cdiv(a, b):
    return -(-a // b)


def _supports_bf16_elementwise():
    """bf16 VPU/EUP exists on v6e/v7x; v5e (and older) keep the f32 path."""
    try:
        kind = jax.devices()[0].device_kind.lower()
    except Exception:
        return False
    return any(tag in kind for tag in ("v6", "v7", "tpu7"))


def prepare_params(params, *, elementwise_bf16=None):
    """One-time (hoisted out of the forward) weight/bias padding + casting.

    * Weights -> bf16, hidden feature dims zero-padded to multiples of 128.
      Exact: tanh(0)=0 and padded weight rows / bias cols are zero, so padded
      lanes stay zero through the network.
    * Hidden-layer biases -> bf16 on v6e/v7x, f32 otherwise (v5e has no bf16
      VPU/EUP). The bias dtype selects the kernel's elementwise path.
    * Last-layer weight/bias keep the true n_output width so the kernel writes
      an unpadded (B, n_out) f32 output.
    """
    if elementwise_bf16 is None:
        elementwise_bf16 = _supports_bf16_elementwise()
    act_dtype = jnp.bfloat16 if elementwise_bf16 else jnp.float32

    (w0, b0), (w1, b1), (w2, b2) = params
    n_in, h0 = w0.shape
    h1, n_out = w1.shape[1], w2.shape[1]
    h0p, h1p = _round_up(h0, LANE), _round_up(h1, LANE)

    def pad_w(w, rows, cols):
        return jnp.pad(w, ((0, rows - w.shape[0]),
                           (0, cols - w.shape[1]))).astype(jnp.bfloat16)

    def pad_b(b, cols, dtype):
        return jnp.pad(b, ((0, 0), (0, cols - b.shape[1]))).astype(dtype)

    return (
        pad_w(w0, n_in, h0p), pad_b(b0, h0p, act_dtype),
        pad_w(w1, h0p, h1p), pad_b(b1, h1p, act_dtype),
        pad_w(w2, h1p, n_out), pad_b(b2, n_out, jnp.float32),
    )


def mlp_kernel(x_ref, w0_ref, b0_ref, w1_ref, b1_ref, w2_ref, b2_ref, o_ref):
    act_dtype = b0_ref.dtype  # bf16 on v6e/v7x, f32 on v5e/older
    # Layer 0: Linear(n_in -> h0) + Tanh. bf16 MXU operands, f32 accumulation.
    h = jnp.dot(x_ref[...], w0_ref[...], preferred_element_type=jnp.float32)
    h = jnp.tanh(h.astype(act_dtype) + b0_ref[...])
    # Layer 1: Linear(h0 -> h1) + Tanh.
    h = jnp.dot(h.astype(jnp.bfloat16), w1_ref[...],
                preferred_element_type=jnp.float32)
    h = jnp.tanh(h.astype(act_dtype) + b1_ref[...])
    # Layer 2: Linear(h1 -> n_out), no activation; bias-add + store in f32.
    out = jnp.dot(h.astype(jnp.bfloat16), w2_ref[...],
                  preferred_element_type=jnp.float32)
    o_ref[...] = (out + b2_ref[...]).astype(o_ref.dtype)


@functools.partial(jax.jit, static_argnames=("tb",))
def simple_mlp_pallas(x, prepared_params, tb=4096):
    """Forward pass. `prepared_params` comes from prepare_params() (done once)."""
    w0p, b0p, w1p, b1p, w2p, b2p = prepared_params
    B, n_in = x.shape
    h0p, h1p = w0p.shape[1], w1p.shape[1]
    n_out = w2p.shape[1]
    act_bytes = jnp.dtype(b0p.dtype).itemsize

    # ---- batch tiling -------------------------------------------------------
    # Large tiles amortize the ~0.35us per grid step. Derive TB from the tile
    # count (not the other way round) so ragged batches pad by at most 7 rows,
    # and force >= 2 grid steps for big batches so the "parallel" batch axis
    # can shard across v7x's two TensorCores.
    n_tiles = _cdiv(B, max(int(tb), SUBLANE))
    if n_tiles == 1 and B >= 2 * SUBLANE:
        n_tiles = 2
    TB = _round_up(_cdiv(B, n_tiles), SUBLANE)

    def vmem_footprint(tb_rows):
        x_t = tb_rows * n_in * 2                         # bf16 input tile
        o_t = tb_rows * n_out * 4                        # f32 output tile
        w = (n_in * h0p + h0p * h1p + h1p * n_out) * 2   # bf16 resident weights
        b = (h0p + h1p) * act_bytes + n_out * 4
        act = tb_rows * max(h0p, h1p) * (4 + act_bytes)  # intermediate activations
        return 2 * (x_t + o_t) + 2 * (w + b) + act       # x/out + consts double-buffered

    # Guard the "all weights VMEM-resident" scheme against v7x's 64 MiB VMEM.
    while TB > SUBLANE and vmem_footprint(TB) > 24 * 1024 * 1024:
        TB = max(SUBLANE, _round_up(TB // 2, SUBLANE))
    # TODO(synk): for very large hidden dims, fall back to an N/K-tiled grid
    # instead of only shrinking the batch tile.

    grid_b = _cdiv(B, TB)
    B_pad = grid_b * TB

    xp = x.astype(jnp.bfloat16)
    if B_pad != B:
        xp = jnp.pad(xp, ((0, B_pad - B), (0, 0)))

    cost = pl.CostEstimate(
        flops=2 * B_pad * (n_in * h0p + h0p * h1p + h1p * n_out),
        transcendentals=B_pad * (h0p + h1p),
        bytes_accessed=(B_pad * n_in * 2
                        + (w0p.size + w1p.size + w2p.size) * 2
                        + (b0p.size + b1p.size) * act_bytes + b2p.size * 4
                        + B_pad * n_out * 4),
    )

    vmem_limit = max(16 * 1024 * 1024,
                     min(2 * vmem_footprint(TB) + (4 << 20), 48 * 1024 * 1024))

    out = pl.pallas_call(
        mlp_kernel,
        out_shape=jax.ShapeDtypeStruct((B_pad, n_out), jnp.float32),
        grid=(grid_b,),
        in_specs=[
            # x tile: pipelined (double-buffered) over the batch grid
            pl.BlockSpec((TB, n_in), lambda i: (i, 0)),
            # weights / biases: constant index_map -> fetched once, VMEM-resident
            pl.BlockSpec((n_in, h0p), lambda i: (0, 0)),
            pl.BlockSpec((1, h0p), lambda i: (0, 0)),
            pl.BlockSpec((h0p, h1p), lambda i: (0, 0)),
            pl.BlockSpec((1, h1p), lambda i: (0, 0)),
            pl.BlockSpec((h1p, n_out), lambda i: (0, 0)),
            pl.BlockSpec((1, n_out), lambda i: (0, 0)),
        ],
        out_specs=pl.BlockSpec((TB, n_out), lambda i: (i, 0)),
        compiler_params=pltpu.CompilerParams(
            dimension_semantics=("parallel",),   # batch axis -> both v7x TCs
            vmem_limit_bytes=int(vmem_limit),
        ),
        cost_estimate=cost,
    )(xp, w0p, b0p, w1p, b1p, w2p, b2p)

    return out if B_pad == B else out[:B]


def init_params(key, n_input, n_output, hidden_dims=(64, 64)):
    """PyTorch nn.Linear-style init: U[-1/sqrt(fan_in), 1/sqrt(fan_in)]."""
    dims = [n_input] + list(hidden_dims) + [n_output]
    params = []
    for d in range(len(dims) - 1):
        fan_in, fan_out = dims[d], dims[d + 1]
        key, kw, kb = jax.random.split(key, 3)
        bound = 1.0 / (fan_in ** 0.5)
        # stored as (in_dim, out_dim) so forward is x @ W + b
        w = jax.random.uniform(kw, (fan_in, fan_out), jnp.float32, -bound, bound)
        b = jax.random.uniform(kb, (1, fan_out), jnp.float32, -bound, bound)
        params.append((w, b))
    return params


def simple_mlp_ref(x, params):
    (w0, b0), (w1, b1), (w2, b2) = params
    h = jnp.tanh(x @ w0 + b0)
    h = jnp.tanh(h @ w1 + b1)
    return h @ w2 + b2


if __name__ == "__main__":
    key = jax.random.PRNGKey(0)
    n_input, n_output = 16, 8
    batch = 8

    kx, kp = jax.random.split(key)
    x = jax.random.normal(kx, (batch, n_input), dtype=jnp.float32)
    params = init_params(kp, n_input, n_output, hidden_dims=(64, 64))

    # One-time weight prep (padding + bf16 cast), hoisted out of the forward.
    prepared = prepare_params(params)

    out = simple_mlp_pallas(x, prepared)
    out = jax.block_until_ready(out)

    ref = simple_mlp_ref(x, params)
    assert out.shape == (batch, n_output)
    # bf16 matmul operands (and bf16 tanh on v6e/v7x) -> relaxed tolerance
    assert jnp.allclose(out, ref, atol=5e-2, rtol=5e-2), (
        f"max abs err {jnp.max(jnp.abs(out - ref))}")

    print("KERNEL_OK")
</pallas_src>

<mosaic_0001>
module attributes {stable_mosaic.version = 11 : i64} {
  func.func @mlp_kernel(%arg0: i32, %arg1: memref<8x16xbf16, #tpu.memory_space<vmem>>, %arg2: memref<16x128xbf16, #tpu.memory_space<vmem>>, %arg3: memref<1x128xf32, #tpu.memory_space<vmem>>, %arg4: memref<128x128xbf16, #tpu.memory_space<vmem>>, %arg5: memref<1x128xf32, #tpu.memory_space<vmem>>, %arg6: memref<128x8xbf16, #tpu.memory_space<vmem>>, %arg7: memref<1x8xf32, #tpu.memory_space<vmem>>, %arg8: memref<8x8xf32, #tpu.memory_space<vmem>>) attributes {dimension_semantics = [#tpu.dimension_semantics<parallel>], iteration_bounds = array<i64: 1>, scalar_prefetch = 0 : i64, scratch_operands = 0 : i64, tpu.core_type = #tpu.core_type<tc>, window_params = [{transform_indices = @transform_0, window_bounds = array<i64: 8, 16>}, {pipeline_mode = #tpu.pipeline_mode<synchronous>, transform_indices = @transform_1, window_bounds = array<i64: 16, 128>}, {pipeline_mode = #tpu.pipeline_mode<synchronous>, transform_indices = @transform_2, window_bounds = array<i64: 1, 128>}, {pipeline_mode = #tpu.pipeline_mode<synchronous>, transform_indices = @transform_3, window_bounds = array<i64: 128, 128>}, {pipeline_mode = #tpu.pipeline_mode<synchronous>, transform_indices = @transform_4, window_bounds = array<i64: 1, 128>}, {pipeline_mode = #tpu.pipeline_mode<synchronous>, transform_indices = @transform_5, window_bounds = array<i64: 128, 8>}, {pipeline_mode = #tpu.pipeline_mode<synchronous>, transform_indices = @transform_6, window_bounds = array<i64: 1, 8>}, {transform_indices = @transform_7, window_bounds = array<i64: 8, 8>}]} {
    %c0 = arith.constant 0 : index
    %c0_0 = arith.constant 0 : index
    %0 = vector.load %arg1[%c0, %c0_0] : memref<8x16xbf16, #tpu.memory_space<vmem>>, vector<8x16xbf16>
    %c0_1 = arith.constant 0 : index
    %c0_2 = arith.constant 0 : index
    %1 = vector.load %arg2[%c0_1, %c0_2] : memref<16x128xbf16, #tpu.memory_space<vmem>>, vector<16x128xbf16>
    %cst = arith.constant dense<0.000000e+00> : vector<8x128xf32>
    %2 = tpu.matmul %0, %1, %cst {dimension_numbers = #tpu.dot_dimension_numbers<[1], [0], [0], [1], [0, 0, 1, 1], [], []>} : vector<8x16xbf16>, vector<16x128xbf16>, vector<8x128xf32> -> vector<8x128xf32>
    %c0_3 = arith.constant 0 : index
    %c0_4 = arith.constant 0 : index
    %3 = vector.load %arg3[%c0_3, %c0_4] : memref<1x128xf32, #tpu.memory_space<vmem>>, vector<1x128xf32>
    %4 = vector.broadcast %3 : vector<1x128xf32> to vector<8x128xf32>
    %5 = arith.addf %2, %4 : vector<8x128xf32>
    %6 = math.tanh %5 : vector<8x128xf32>
    %7 = arith.truncf %6 : vector<8x128xf32> to vector<8x128xbf16>
    %c0_5 = arith.constant 0 : index
    %c0_6 = arith.constant 0 : index
    %8 = vector.load %arg4[%c0_5, %c0_6] : memref<128x128xbf16, #tpu.memory_space<vmem>>, vector<128x128xbf16>
    %cst_7 = arith.constant dense<0.000000e+00> : vector<8x128xf32>
    %9 = tpu.matmul %7, %8, %cst_7 {dimension_numbers = #tpu.dot_dimension_numbers<[1], [0], [0], [1], [0, 0, 1, 1], [], []>} : vector<8x128xbf16>, vector<128x128xbf16>, vector<8x128xf32> -> vector<8x128xf32>
    %c0_8 = arith.constant 0 : index
    %c0_9 = arith.constant 0 : index
    %10 = vector.load %arg5[%c0_8, %c0_9] : memref<1x128xf32, #tpu.memory_space<vmem>>, vector<1x128xf32>
    %11 = vector.broadcast %10 : vector<1x128xf32> to vector<8x128xf32>
    %12 = arith.addf %9, %11 : vector<8x128xf32>
    %13 = math.tanh %12 : vector<8x128xf32>
    %14 = arith.truncf %13 : vector<8x128xf32> to vector<8x128xbf16>
    %c0_10 = arith.constant 0 : index
    %c0_11 = arith.constant 0 : index
    %15 = vector.load %arg6[%c0_10, %c0_11] : memref<128x8xbf16, #tpu.memory_space<vmem>>, vector<128x8xbf16>
    %cst_12 = arith.constant dense<0.000000e+00> : vector<8x8xf32>
    %16 = tpu.matmul %14, %15, %cst_12 {dimension_numbers = #tpu.dot_dimension_numbers<[1], [0], [0], [1], [0, 0, 1, 1], [], []>} : vector<8x128xbf16>, vector<128x8xbf16>, vector<8x8xf32> -> vector<8x8xf32>
    %c0_13 = arith.constant 0 : index
    %c0_14 = arith.constant 0 : index
    %17 = vector.load %arg7[%c0_13, %c0_14] : memref<1x8xf32, #tpu.memory_space<vmem>>, vector<1x8xf32>
    %18 = vector.broadcast %17 : vector<1x8xf32> to vector<8x8xf32>
    %19 = arith.addf %16, %18 : vector<8x8xf32>
    %c0_15 = arith.constant 0 : index
    %c0_16 = arith.constant 0 : index
    %20 = vector.load %arg8[%c0_15, %c0_16] : memref<8x8xf32, #tpu.memory_space<vmem>>, vector<8x8xf32>
    tpu.vector_store %arg8[%c0_15, %c0_16], %19 {strides = array<i32>} : memref<8x8xf32, #tpu.memory_space<vmem>>, vector<8x8xf32>,
    return
  }
  func.func @transform_0(%arg0: i32) -> (i32, i32) {
    %c0_i32 = arith.constant 0 : i32
    %c0_i32_0 = arith.constant 0 : i32
    return %arg0, %c0_i32 : i32, i32
  }
  func.func @transform_1(%arg0: i32) -> (i32, i32) {
    %c0_i32 = arith.constant 0 : i32
    %c0_i32_0 = arith.constant 0 : i32
    %c0_i32_1 = arith.constant 0 : i32
    return %c0_i32, %c0_i32_0 : i32, i32
  }
  func.func @transform_2(%arg0: i32) -> (i32, i32) {
    %c0_i32 = arith.constant 0 : i32
    %c0_i32_0 = arith.constant 0 : i32
    %c0_i32_1 = arith.constant 0 : i32
    return %c0_i32, %c0_i32_0 : i32, i32
  }
  func.func @transform_3(%arg0: i32) -> (i32, i32) {
    %c0_i32 = arith.constant 0 : i32
    %c0_i32_0 = arith.constant 0 : i32
    %c0_i32_1 = arith.constant 0 : i32
    return %c0_i32, %c0_i32_0 : i32, i32
  }
  func.func @transform_4(%arg0: i32) -> (i32, i32) {
    %c0_i32 = arith.constant 0 : i32
    %c0_i32_0 = arith.constant 0 : i32
    %c0_i32_1 = arith.constant 0 : i32
    return %c0_i32, %c0_i32_0 : i32, i32
  }
  func.func @transform_5(%arg0: i32) -> (i32, i32) {
    %c0_i32 = arith.constant 0 : i32
    %c0_i32_0 = arith.constant 0 : i32
    %c0_i32_1 = arith.constant 0 : i32
    return %c0_i32, %c0_i32_0 : i32, i32
  }
  func.func @transform_6(%arg0: i32) -> (i32, i32) {
    %c0_i32 = arith.constant 0 : i32
    %c0_i32_0 = arith.constant 0 : i32
    %c0_i32_1 = arith.constant 0 : i32
    return %c0_i32, %c0_i32_0 : i32, i32
  }
  func.func @transform_7(%arg0: i32) -> (i32, i32) {
    %c0_i32 = arith.constant 0 : i32
    %c0_i32_0 = arith.constant 0 : i32
    return %arg0, %c0_i32 : i32, i32
  }
}

</mosaic_0001>

<bundles_post_ra>
// kernel: simple_mlp_pallas.1
= control target key start
LH: loop header
LB: loop body
LE: loop exit
PB: predicated region body
PF: predicated region fallthrough
CT: control target
= control target key end

     0   :  { %v463_v1 = vmov 0.0   ;;  %vm464_vm0 = vmmov 0   ;;  %vm44_vm1 = vcmask 130048   ;;  %s592_s0 = inlined_call_operand.vmem [shape: bf16[8,16], index: 0, kind: input, shape index: {}]   ;;  %s593_s1 = inlined_call_operand.vmem [shape: bf16[16,128], index: 1, kind: input, shape index: {}]   ;;  %s594_s2 = inlined_call_operand.vmem [shape: f32[1,128], index: 2, kind: input, shape index: {}]   ;;  %s595_s3 = inlined_call_operand.vmem [shape: bf16[128,128], index: 3, kind: input, shape index: {}]   ;;  %s596_s4 = inlined_call_operand.vmem [shape: f32[1,128], index: 4, kind: input, shape index: {}]   ;;  %s597_s5 = inlined_call_operand.vmem [shape: bf16[128,8], index: 5, kind: input, shape index: {}]   ;;  %s598_s6 = inlined_call_operand.vmem [shape: f32[1,8], index: 6, kind: input, shape index: {}]   ;;  %s599_s7 = inlined_call_operand.hbm [shape: f32[8,8], index: 7, kind: output, shape index: {}]  }
   0x1   :  { %v420_v0 = vld [vmem:[%s593_s1] sm:$0xff]   ;;  %371 = vmatprep.subr.bf16.mxu0 %v463_v1  ;;  %377 = vmatprep.subr.bf16.mxu1 %v463_v1  ;;  %v421_v3 = vld [vmem:[%s595_s3 + $0x38] sm:$0xff]   ;;  %v422_v4 = vld [vmem:[%s595_s3 + $0x30] sm:$0xff]  }
   0x2   :  { %v28_v2 = vld [vmem:[%s592_s0] sm:$0xf]  ;;  %372 = vmatpush3.bf16.msra.mxu0 %v420_v0  ;;  %373 = vmatprep.mubr.msk.bf16.mxu0 %vm464_vm0, %v463_v1  ;;  %v423_v5 = vld [vmem:[%s595_s3 + $0x28] sm:$0xff]  }
   0x3   :  { %393 = vmatprep.mubr.msk.bf16.mxu1 %vm464_vm0, %v463_v1  ;;  %397 = vmatprep.subr.bf16.mxu0 %v463_v1 }
   0x4   :  { %378 = vmatpush3.bf16.msra.mxu1 %v421_v3 }
   0x5   :  { %374 = vmatmul.mubr.msk.bf16.vlgmr.msra.gmra.mxu0 %vm44_vm1, %v28_v2  ;;  %379 = vmatprep.subr.bf16.mxu1 %v463_v1 }
   0x6   :  { %413 = vmatprep.mubr.msk.bf16.mxu0 %vm464_vm0, %v463_v1 }
   0x8   :  { %380 = vmatpush3.bf16.msra.mxu1 %v422_v4 }
   0x9   :  { %381 = vmatprep.subr.bf16.mxu1 %v463_v1 }
   0xc   :  { %382 = vmatpush3.bf16.msra.mxu1 %v423_v5 }
   0xd   :  { %383 = vmatprep.subr.bf16.mxu1 %v463_v1 }
   0xe   :  { %12 = vsyncpa [#allocation3], 0  ;;  %v424_v6 = vld [vmem:[%s595_s3 + $0x20] sm:$0xff]   ;;  %v425_v7 = vld [vmem:[%s595_s3 + $0x18] sm:$0xff]   ;;  %s465_s14 = smov [#allocation2]   ;;  %vm314_vm2 = vcmask 64512  }
   0xf   :  { %v426_v8 = vld [vmem:[%s595_s3 + $0x10] sm:$0xff]   ;;  %v427_v9 = vld [vmem:[%s595_s3 + $0x8] sm:$0xff]   ;;  %v428_v10 = vld [vmem:[%s595_s3] sm:$0xff]  }
  0x10   :  { %384 = vmatpush3.bf16.msra.mxu1 %v424_v6  ;;  %v429_v11 = vld [vmem:[%s597_s5 + $0x38] sm:$0xff]   ;;  %v430_v12 = vld [vmem:[%s597_s5 + $0x30] sm:$0xff]   ;;  %v431_v13 = vld [vmem:[%s597_s5 + $0x28] sm:$0xff]  }
  0x11   :  { %385 = vmatprep.subr.bf16.mxu1 %v463_v1  ;;  %398 = vmatpush3.bf16.msra.mxu0 %v429_v11  ;;  %v330_v14 = vld [vmem:[%s594_s2] ss:$0 sm:$0xff]  ;;  %v433_v23 = vld [vmem:[%s597_s5 + $0x18] sm:$0xff]   ;;  %v434_v24 = vld [vmem:[%s597_s5 + $0x10] sm:$0xff]  }
  0x12   :  { %399 = vmatprep.subr.bf16.mxu0 %v463_v1  ;;  %v432_v22 = vld [vmem:[%s597_s5 + $0x20] sm:$0xff]   ;;  %v435_v25 = vld [vmem:[%s597_s5 + $0x8] sm:$0xff]  }
  0x13   :  { %v436_v26 = vld [vmem:[%s597_s5] sm:$0xff]   ;;  %s322_s5 = sshll.u32 %s465_s14, 4  ;;  %s323_s5 = int_to_ptr.vmem [resolvable:$true] %s322_s5 }
  0x14   :  { %386 = vmatpush3.bf16.msra.mxu1 %v425_v7  ;;  %v333_v27 = vld [vmem:[%s596_s4] ss:$0 sm:$0xff]  ;;  %s441_s4 = scalar_lea.vmem %s323_s5, 128  ;;  %p446_p1 = scmp.lt.s32.totalorder %s323_s5, %s323_s5 }
  0x15   :  { %387 = vmatprep.subr.bf16.mxu1 %v463_v1  ;;  %400 = vmatpush3.bf16.msra.mxu0 %v430_v12  ;;  %v342_v35 = vld [vmem:[%s598_s6] ss:$0 sm:$0xff]  ;;  %p442_p0 = scmp.ne.s32.totalorder %s323_s5, %s441_s4  ;;  %p447_p2 = scmp.lt.s32.totalorder %s441_s4, %s441_s4 }
  0x16   :  { %401 = vmatprep.subr.bf16.mxu0 %v463_v1 }
  0x17   :  { %p448_p3 = por %p447_p2, %p446_p1 }
  0x18   :  { %388 = vmatpush3.bf16.msra.mxu1 %v426_v8 }
  0x19   :  { %389 = vmatprep.subr.bf16.mxu1 %v463_v1  ;;  %402 = vmatpush3.bf16.msra.mxu0 %v431_v13  ;;  %p449_p4 = pnand %p448_p3, %p442_p0 }
  0x1a   :  { %403 = vmatprep.subr.bf16.mxu0 %v463_v1 }
  0x1c   :  { %390 = vmatpush3.bf16.msra.mxu1 %v427_v9 }
  0x1d   :  { %391 = vmatprep.subr.bf16.mxu1 %v463_v1  ;;  %404 = vmatpush3.bf16.msra.mxu0 %v432_v22 }
  0x1e   :  { %405 = vmatprep.subr.bf16.mxu0 %v463_v1 }
  0x20   :  { %392 = vmatpush3.bf16.msra.mxu1 %v428_v10 }
  0x21   :  { %406 = vmatpush3.bf16.msra.mxu0 %v433_v23 }
  0x22   :  { %407 = vmatprep.subr.bf16.mxu0 %v463_v1 }
  0x25   :  { %408 = vmatpush3.bf16.msra.mxu0 %v434_v24 }
  0x26   :  { %409 = vmatprep.subr.bf16.mxu0 %v463_v1 }
  0x29   :  { %410 = vmatpush3.bf16.msra.mxu0 %v435_v25 }
  0x2a   :  { %411 = vmatprep.subr.bf16.mxu0 %v463_v1 }
  0x2d   :  { %412 = vmatpush3.bf16.msra.mxu0 %v436_v26 }
  0xc5   :  { %v82_v15 = vpop.f32.mrf.mxu0 }
  0xc6   :  { %v83_v16 = vadd.f32 %v330_v14, %v82_v15 }
  0xc7   :  { %v375_v17 = vpop.f32.mrf.mxu0 }
  0xc8   :  { %437 = vtanh.f32 %v83_v16 }
  0xc9   :  { %v85_v18 = vpop.f32.mrf.mxu0 }
  0xcb   :  { %v376_v19 = vpop.f32.mrf.mxu0 }
  0xd5   :  { %v438_v20 = vpop.eup %437 }
  0xd6   :  { %v89_v21 = vpack.c.bf16 %v438_v20, %v438_v20 }
  0xd8   :  { %394 = vmatmul.mubr.bf16.vlgmr.msra.gmra.mxu1 %v89_v21 }
 0x198   :  { %v195_v28 = vpop.f32.mrf.mxu1 }
 0x199   :  { %v196_v29 = vadd.f32 %v333_v27, %v195_v28 }
 0x19a   :  { %v395_v30 = vpop.f32.mrf.mxu1 }
 0x19b   :  { %439 = vtanh.f32 %v196_v29 }
 0x19c   :  { %v198_v31 = vpop.f32.mrf.mxu1 }
 0x19e   :  { %v396_v32 = vpop.f32.mrf.mxu1 }
 0x1a8   :  { %v440_v33 = vpop.eup %439 }
 0x1a9   :  { %v202_v34 = vpack.c.bf16 %v440_v33, %v440_v33 }
 0x1ab   :  { %414 = vmatmul.mubr.bf16.vlgmr.msra.gmra.mxu0 %v202_v34 }
 0x26b   :  { %v308_v36 = vpop.f32.mrf.mxu0 }
 0x26c   :  { %v309_v37 = vadd.f32 %v342_v35, %v308_v36 }
 0x26d   :  { %v415_v38 = vpop.f32.mrf.mxu0 }
 0x26e   :  { %315 = vst.msk [vmem:[#allocation2] sm:$0xff] %vm314_vm2, %v309_v37 }
 0x26f   :  { %v311_v39 = vpop.f32.mrf.mxu0 }
 0x270   :  { %452 = shalt.err (!%p449_p4)
}
 0x271   :  { %325 = dma.vmem_to_hbm [thread:$0]  %s323_s5, 128, %s599_s7, [#allocation3]   ;;  %v416_v40 = vpop.f32.mrf.mxu0 }
 0x272   :  { %461 = dma.done.wait [#allocation3], 128  }
 0x273   :  { %462 = vsyncadd [#allocation3], 4294967168 }
 0x274   :  { %329 = vsyncpa [#allocation3], 1 }

</bundles_post_ra>
